<compile_context>
chip_gen: v5e
topology: v5e:2x2
jax: 0.10.0
libtpu: 0.0.40
codegen_flags: <defaults>
</compile_context>

<pallas_src>
import jax
import jax.numpy as jnp
from jax.experimental import pallas as pl
from jax.experimental.pallas import tpu as pltpu


def _round_up(x, m):
    return ((x + m - 1) // m) * m


def _round_down(x, m):
    return (x // m) * m


def _attention_kernel(row_ref, col_ref, w_ref, o_ref):
    # row_ref / col_ref: (tm, D); w_ref: (2, D) with row 0 = w_row, row 1 = w_col.
    # Contract both operands over their last (feature) axis so the MXU emits the
    # result directly along the lane axis -> lane-dense (1, tm) output block.
    dn = (((1,), (1,)), ((), ()))
    e = jax.lax.dot_general(
        w_ref[0:1, :], row_ref[...], dn, preferred_element_type=jnp.float32
    ) + jax.lax.dot_general(
        w_ref[1:2, :], col_ref[...], dn, preferred_element_type=jnp.float32
    )
    # LeakyReLU, slope 0.2 (VPU).
    o_ref[...] = jnp.where(e >= 0, e, 0.2 * e).astype(o_ref.dtype)


def _vmem_limit_bytes():
    # Generation-aware scoped-VMEM limit: ~75% of physical, capped at 100 MiB.
    # v7x: 64 MiB physical -> 48 MiB; v5e/v6e: 128 MiB -> 96 MiB.
    try:
        cap = pltpu.get_tpu_info().vmem_capacity_bytes
    except Exception:  # fall back to the smallest generation (v7x per-TC)
        cap = 64 * 1024 * 1024
    return max(min(cap * 3 // 4, 100 * 1024 * 1024), 32 * 1024 * 1024)


def _choose_tile(n, d, itemsize, vmem_limit, target_bytes=4 * 1024 * 1024):
    # Bytes-per-step target: each grid step should stream ~4 MiB of real input
    # data so the ~0.35 us per-step pipeline overhead is well amortized.
    tm_target = max(128, _round_down(target_bytes // (2 * d * itemsize), 128))
    # VMEM budget: 2 inputs x 2 pipeline buffers of (tm, d) blocks, where the
    # lane (minor) dim is physically padded to 128 in VMEM.
    d_pad = _round_up(d, 128)
    budget = max(vmem_limit - 4 * 1024 * 1024, 8 * 1024 * 1024)
    bytes_per_row = 4 * d_pad * itemsize
    tm_vmem = max(128, _round_down(budget // bytes_per_row, 128))
    tm = min(tm_target, tm_vmem, _round_up(n, 128))
    # v7x has 2 TensorCores: make sure the "parallel" grid axis has >= 2 steps.
    while tm > 128 and pl.cdiv(n, tm) < 2:
        tm = max(128, _round_down(tm // 2, 128))
    return tm


@jax.jit
def attention_forward(row_embs, col_embs, weight):
    """weight: [1, 2*D] in PyTorch nn.Linear layout (out_features, in_features)."""
    n, d = row_embs.shape
    assert col_embs.shape == (n, d)
    assert weight.shape == (1, 2 * d)

    itemsize = jnp.dtype(row_embs.dtype).itemsize
    vmem_limit = _vmem_limit_bytes()
    tm = _choose_tile(n, d, itemsize, vmem_limit)

    # Ragged grid: no jnp.pad of the inputs (that would re-stream both embedding
    # matrices through HBM). The partial last block's garbage only lands in
    # output columns >= n, which are sliced off below.
    grid = (pl.cdiv(n, tm),)
    n_out = _round_up(n, 128)  # lane-dense output slab

    # Split the weight so the concat never materializes:
    #   concat(row, col) @ W.T == row @ W[:, :D].T + col @ W[:, D:].T
    # Cast to the streamed operands' dtype (keeps bf16 inputs on the native path;
    # accumulation stays f32 via preferred_element_type inside the kernel).
    w_both = jnp.concatenate([weight[:, :d], weight[:, d:]], axis=0).astype(
        row_embs.dtype
    )

    # TODO(synk): for D < 128 (the module's D=16/32 cases) the tiled HBM layout
    # pads the minor dim to 128 lanes, so the DMA streams ~128/D x more bytes
    # than useful; fixing that requires a lane-dense packing (or fusion) in the
    # producer of row_embs/col_embs, outside this op.

    cost = pl.CostEstimate(
        flops=4 * n * d,
        transcendentals=0,
        bytes_accessed=2 * n * d * itemsize + n * itemsize + 2 * d * itemsize,
    )

    out = pl.pallas_call(
        _attention_kernel,
        out_shape=jax.ShapeDtypeStruct((1, n_out), row_embs.dtype),
        grid_spec=pltpu.PrefetchScalarGridSpec(
            num_scalar_prefetch=0,
            grid=grid,
            in_specs=[
                pl.BlockSpec((tm, d), lambda i: (i, 0)),
                pl.BlockSpec((tm, d), lambda i: (i, 0)),
                pl.BlockSpec((2, d), lambda i: (0, 0)),  # resident weight
            ],
            out_specs=pl.BlockSpec((1, tm), lambda i: (0, i)),  # lane-dense slab
        ),
        compiler_params=pltpu.CompilerParams(
            dimension_semantics=("parallel",),  # v7x: shard grid over 2 TCs
            vmem_limit_bytes=vmem_limit,
        ),
        cost_estimate=cost,
    )(row_embs, col_embs, w_both)

    return out.reshape(-1, 1)[:n]


class AttentionPallas:
    """JAX/Pallas port of the PyTorch Attention module."""

    def __init__(self, input_size, out_size, key):
        self.input_size = input_size
        self.out_size = out_size
        k1, k2 = jax.random.split(key)
        # Deterministic init mimicking nn.Linear's U(-1/sqrt(fan_in), 1/sqrt(fan_in)).
        b_raw = 1.0 / jnp.sqrt(2.0 * input_size)
        b_emb = 1.0 / jnp.sqrt(2.0 * out_size)
        self.w_raw = jax.random.uniform(
            k1, (1, 2 * input_size), jnp.float32, -b_raw, b_raw
        )
        self.w_emb = jax.random.uniform(
            k2, (1, 2 * out_size), jnp.float32, -b_emb, b_emb
        )

    def __call__(self, row_embs, col_embs):
        d = row_embs.shape[1]
        if d == self.out_size:
            weight = self.w_emb
        elif d == self.input_size:
            # TODO(synk): PyTorch's input_size branch is dead code (NameError bug:
            # `fatt` assigned, `att` used). We faithfully do not support it.
            raise NameError("att is not defined (faithful to PyTorch bug)")
        else:
            raise NameError("att is not defined")
        return attention_forward(row_embs, col_embs, weight)


def _reference(row_embs, col_embs, weight):
    e = jnp.concatenate([row_embs, col_embs], axis=1) @ weight.T
    return jnp.where(e >= 0, e, 0.2 * e)


if __name__ == "__main__":
    key = jax.random.PRNGKey(0)
    k_mod, k_row, k_col = jax.random.split(key, 3)

    input_size = 16
    out_size = 32
    n_pairs = 8  # number of node pairs

    module = AttentionPallas(input_size, out_size, k_mod)

    row_embs = jax.random.normal(k_row, (n_pairs, out_size), jnp.float32)
    col_embs = jax.random.normal(k_col, (n_pairs, out_size), jnp.float32)

    out = module(row_embs, col_embs)
    out = jax.block_until_ready(out)

    ref = _reference(row_embs, col_embs, module.w_emb)
    assert out.shape == (n_pairs, 1)
    assert jnp.allclose(out, ref, atol=1e-5, rtol=1e-5)

    print("KERNEL_OK")
</pallas_src>

<mosaic_0001>
module attributes {stable_mosaic.version = 11 : i64} {
  func.func @_attention_kernel(%arg0: i32, %arg1: memref<128x32xf32, #tpu.memory_space<vmem>>, %arg2: memref<128x32xf32, #tpu.memory_space<vmem>>, %arg3: memref<2x32xf32, #tpu.memory_space<vmem>>, %arg4: memref<1x128xf32, #tpu.memory_space<vmem>>) attributes {dimension_semantics = [#tpu.dimension_semantics<parallel>], iteration_bounds = array<i64: 1>, scalar_prefetch = 0 : i64, scratch_operands = 0 : i64, tpu.core_type = #tpu.core_type<tc>, window_params = [{transform_indices = @transform_0, window_bounds = array<i64: 128, 32>}, {transform_indices = @transform_1, window_bounds = array<i64: 128, 32>}, {pipeline_mode = #tpu.pipeline_mode<synchronous>, transform_indices = @transform_2, window_bounds = array<i64: 2, 32>}, {transform_indices = @transform_3, window_bounds = array<i64: 1, 128>}]} {
    %c0 = arith.constant 0 : index
    %c0_0 = arith.constant 0 : index
    %0 = vector.load %arg3[%c0, %c0_0] : memref<2x32xf32, #tpu.memory_space<vmem>>, vector<1x32xf32>
    %c0_1 = arith.constant 0 : index
    %c0_2 = arith.constant 0 : index
    %1 = vector.load %arg1[%c0_1, %c0_2] : memref<128x32xf32, #tpu.memory_space<vmem>>, vector<128x32xf32>
    %cst = arith.constant dense<0.000000e+00> : vector<1x128xf32>
    %2 = tpu.matmul %0, %1, %cst {dimension_numbers = #tpu.dot_dimension_numbers<[1], [1], [0], [0], [0, 0, 1, 0], [], []>} : vector<1x32xf32>, vector<128x32xf32>, vector<1x128xf32> -> vector<1x128xf32>
    %c1 = arith.constant 1 : index
    %c0_3 = arith.constant 0 : index
    %3 = vector.load %arg3[%c1, %c0_3] : memref<2x32xf32, #tpu.memory_space<vmem>>, vector<1x32xf32>
    %c0_4 = arith.constant 0 : index
    %c0_5 = arith.constant 0 : index
    %4 = vector.load %arg2[%c0_4, %c0_5] : memref<128x32xf32, #tpu.memory_space<vmem>>, vector<128x32xf32>
    %cst_6 = arith.constant dense<0.000000e+00> : vector<1x128xf32>
    %5 = tpu.matmul %3, %4, %cst_6 {dimension_numbers = #tpu.dot_dimension_numbers<[1], [1], [0], [0], [0, 0, 1, 0], [], []>} : vector<1x32xf32>, vector<128x32xf32>, vector<1x128xf32> -> vector<1x128xf32>
    %6 = arith.addf %2, %5 : vector<1x128xf32>
    %cst_7 = arith.constant 0.000000e+00 : f32
    %7 = vector.broadcast %cst_7 : f32 to vector<1x128xf32>
    %8 = arith.cmpf oge, %6, %7 : vector<1x128xf32>
    %cst_8 = arith.constant 2.000000e-01 : f32
    %9 = vector.broadcast %cst_8 : f32 to vector<1x128xf32>
    %10 = arith.mulf %9, %6 : vector<1x128xf32>
    %11 = arith.select %8, %6, %10 : vector<1x128xi1>, vector<1x128xf32>
    %c0_9 = arith.constant 0 : index
    %c0_10 = arith.constant 0 : index
    %12 = vector.load %arg4[%c0_9, %c0_10] : memref<1x128xf32, #tpu.memory_space<vmem>>, vector<1x128xf32>
    tpu.vector_store %arg4[%c0_9, %c0_10], %11 {strides = array<i32>} : memref<1x128xf32, #tpu.memory_space<vmem>>, vector<1x128xf32>,
    return
  }
  func.func @transform_0(%arg0: i32) -> (i32, i32) {
    %c0_i32 = arith.constant 0 : i32
    %c0_i32_0 = arith.constant 0 : i32
    return %arg0, %c0_i32 : i32, i32
  }
  func.func @transform_1(%arg0: i32) -> (i32, i32) {
    %c0_i32 = arith.constant 0 : i32
    %c0_i32_0 = arith.constant 0 : i32
    return %arg0, %c0_i32 : i32, i32
  }
  func.func @transform_2(%arg0: i32) -> (i32, i32) {
    %c0_i32 = arith.constant 0 : i32
    %c0_i32_0 = arith.constant 0 : i32
    %c0_i32_1 = arith.constant 0 : i32
    return %c0_i32, %c0_i32_0 : i32, i32
  }
  func.func @transform_3(%arg0: i32) -> (i32, i32) {
    %c0_i32 = arith.constant 0 : i32
    %c0_i32_0 = arith.constant 0 : i32
    return %c0_i32, %arg0 : i32, i32
  }
}

</mosaic_0001>

<bundles_post_ra>
// kernel: attention_forward.1
= control target key start
LH: loop header
LB: loop body
LE: loop exit
PB: predicated region body
PF: predicated region fallthrough
CT: control target
= control target key end

     0   :  { %8 = vsyncpa [#allocation3], 0  ;;  %s396_s0 = inlined_call_operand.vmem [shape: f32[8,32], index: 0, kind: input, shape index: {}]   ;;  %s397_s1 = inlined_call_operand.hbm [shape: f32[8,32], index: 1, kind: input, shape index: {}]   ;;  %s398_s2 = inlined_call_operand.vmem [shape: f32[2,32], index: 2, kind: input, shape index: {}]   ;;  %s399_s3 = inlined_call_operand.vmem [shape: f32[1,128], index: 3, kind: output, shape index: {}]  }
   0x1   :  { %14 = vsyncadd [#allocation3], 1920  ;;  %s15_s14 = sshll.u32 %s397_s1, 4  ;;  %s279_s15 = smov [#allocation2]   ;;  %s16_s14 = int_to_ptr.hbm [resolvable:$true] %s15_s14 }
   0x2   :  { %s17_s16 = sshll.u32 %s279_s15, 4  ;;  %s280_s17 = smov 128   ;;  %s18_s16 = int_to_ptr.vmem [resolvable:$true] %s17_s16 }
   0x3   :  { %s281_s18 = smov 8  }
   0x4   :  { %23 = dma.hbm_to_vmem [thread:$0]  %s16_s14, 128, %s18_s16, [#allocation3], %s280_s17, %s280_s17, %s281_s18  }
   0x5   :  { %277 = dma.done.wait [#allocation3], 2048  }
   0x6   :  { %278 = vsyncadd [#allocation3], 4294965248  ;;  %vm64_vm0 = vcmask 261120   ;;  %v63_v0 = vld [vmem:[#allocation2 + $0x78] sm:$0xff]  ;;  %v62_v2 = vld [vmem:[#allocation2 + $0x70] sm:$0xff] }
   0x7   :  { %v46_v1 = vld [vmem:[%s396_s0 + $0x78] sm:$0xff]  ;;  %216 = vmatpush.xpose.msk.msra.mxu0 %vm64_vm0, %v63_v0  ;;  %v45_v3 = vld [vmem:[%s396_s0 + $0x70] sm:$0xff]  ;;  %v61_v4 = vld [vmem:[#allocation2 + $0x68] sm:$0xff] }
   0x8   :  { %233 = vmatpush.xpose.msk.msra.mxu1 %vm64_vm0, %v46_v1  ;;  %v44_v5 = vld [vmem:[%s396_s0 + $0x68] sm:$0xff]  ;;  %v60_v6 = vld [vmem:[#allocation2 + $0x60] sm:$0xff]  ;;  %v59_v8 = vld [vmem:[#allocation2 + $0x58] sm:$0xff] }
   0x9   :  { %v43_v7 = vld [vmem:[%s396_s0 + $0x60] sm:$0xff]  ;;  %v42_v9 = vld [vmem:[%s396_s0 + $0x58] sm:$0xff]  ;;  %v58_v10 = vld [vmem:[#allocation2 + $0x50] sm:$0xff] }
   0xa   :  { %v41_v11 = vld [vmem:[%s396_s0 + $0x50] sm:$0xff]  ;;  %v57_v12 = vld [vmem:[#allocation2 + $0x48] sm:$0xff]  ;;  %v56_v14 = vld [vmem:[#allocation2 + $0x40] sm:$0xff] }
   0xb   :  { %217 = vmatpush.xpose.msk.msra.mxu0 %vm64_vm0, %v62_v2  ;;  %v40_v13 = vld [vmem:[%s396_s0 + $0x48] sm:$0xff]  ;;  %v39_v15 = vld [vmem:[%s396_s0 + $0x40] sm:$0xff]  ;;  %v55_v16 = vld [vmem:[#allocation2 + $0x38] sm:$0xff] }
   0xc   :  { %234 = vmatpush.xpose.msk.msra.mxu1 %vm64_vm0, %v45_v3  ;;  %v38_v17 = vld [vmem:[%s396_s0 + $0x38] sm:$0xff]  ;;  %v54_v18 = vld [vmem:[#allocation2 + $0x30] sm:$0xff]  ;;  %v53_v20 = vld [vmem:[#allocation2 + $0x28] sm:$0xff] }
   0xd   :  { %v37_v19 = vld [vmem:[%s396_s0 + $0x30] sm:$0xff]  ;;  %v36_v21 = vld [vmem:[%s396_s0 + $0x28] sm:$0xff]  ;;  %v52_v22 = vld [vmem:[#allocation2 + $0x20] sm:$0xff] }
   0xe   :  { %v35_v23 = vld [vmem:[%s396_s0 + $0x20] sm:$0xff]  ;;  %v51_v24 = vld [vmem:[#allocation2 + $0x18] sm:$0xff]  ;;  %v50_v26 = vld [vmem:[#allocation2 + $0x10] sm:$0xff] }
   0xf   :  { %218 = vmatpush.xpose.msk.msra.mxu0 %vm64_vm0, %v61_v4  ;;  %v34_v25 = vld [vmem:[%s396_s0 + $0x18] sm:$0xff]  ;;  %v33_v27 = vld [vmem:[%s396_s0 + $0x10] sm:$0xff]  ;;  %v49_v28 = vld [vmem:[#allocation2 + $0x8] sm:$0xff] }
  0x10   :  { %235 = vmatpush.xpose.msk.msra.mxu1 %vm64_vm0, %v44_v5  ;;  %v32_v29 = vld [vmem:[%s396_s0 + $0x8] sm:$0xff]  ;;  %v48_v30 = vld [vmem:[#allocation2] sm:$0xff] }
  0x11   :  { %v31_v31 = vld [vmem:[%s396_s0] sm:$0xff] }
  0x12   :  { %v47_v32 = vld [vmem:[%s398_s2 + $0x1] sm:$0x1]  ;;  %v30_v33 = vld [vmem:[%s398_s2] sm:$0x1] }
  0x13   :  { %219 = vmatpush.xpose.msk.msra.mxu0 %vm64_vm0, %v60_v6 }
  0x14   :  { %236 = vmatpush.xpose.msk.msra.mxu1 %vm64_vm0, %v43_v7 }
  0x17   :  { %220 = vmatpush.xpose.msk.msra.mxu0 %vm64_vm0, %v59_v8 }
  0x18   :  { %237 = vmatpush.xpose.msk.msra.mxu1 %vm64_vm0, %v42_v9 }
  0x1b   :  { %221 = vmatpush.xpose.msk.msra.mxu0 %vm64_vm0, %v58_v10 }
  0x1c   :  { %238 = vmatpush.xpose.msk.msra.mxu1 %vm64_vm0, %v41_v11 }
  0x1f   :  { %222 = vmatpush.xpose.msk.msra.mxu0 %vm64_vm0, %v57_v12 }
  0x20   :  { %239 = vmatpush.xpose.msk.msra.mxu1 %vm64_vm0, %v40_v13 }
  0x23   :  { %223 = vmatpush.xpose.msk.msra.mxu0 %vm64_vm0, %v56_v14 }
  0x24   :  { %240 = vmatpush.xpose.msk.msra.mxu1 %vm64_vm0, %v39_v15 }
  0x27   :  { %224 = vmatpush.xpose.msk.msra.mxu0 %vm64_vm0, %v55_v16 }
  0x28   :  { %241 = vmatpush.xpose.msk.msra.mxu1 %vm64_vm0, %v38_v17 }
  0x2b   :  { %225 = vmatpush.xpose.msk.msra.mxu0 %vm64_vm0, %v54_v18 }
  0x2c   :  { %242 = vmatpush.xpose.msk.msra.mxu1 %vm64_vm0, %v37_v19 }
  0x2f   :  { %226 = vmatpush.xpose.msk.msra.mxu0 %vm64_vm0, %v53_v20 }
  0x30   :  { %243 = vmatpush.xpose.msk.msra.mxu1 %vm64_vm0, %v36_v21 }
  0x33   :  { %227 = vmatpush.xpose.msk.msra.mxu0 %vm64_vm0, %v52_v22 }
  0x34   :  { %244 = vmatpush.xpose.msk.msra.mxu1 %vm64_vm0, %v35_v23 }
  0x37   :  { %228 = vmatpush.xpose.msk.msra.mxu0 %vm64_vm0, %v51_v24 }
  0x38   :  { %245 = vmatpush.xpose.msk.msra.mxu1 %vm64_vm0, %v34_v25 }
  0x3b   :  { %229 = vmatpush.xpose.msk.msra.mxu0 %vm64_vm0, %v50_v26 }
  0x3c   :  { %246 = vmatpush.xpose.msk.msra.mxu1 %vm64_vm0, %v33_v27 }
  0x3f   :  { %230 = vmatpush.xpose.msk.msra.mxu0 %vm64_vm0, %v49_v28 }
  0x40   :  { %247 = vmatpush.xpose.msk.msra.mxu1 %vm64_vm0, %v32_v29 }
  0x43   :  { %231 = vmatpush.xpose.msk.msra.mxu0 %vm64_vm0, %v48_v30 }
  0x44   :  { %248 = vmatpush.xpose.msk.msra.mxu1 %vm64_vm0, %v31_v31 }
  0x46   :  { %232 = vmatmul.msk.f32.vlgmr.msra.gmra.mxu0 %vm64_vm0, %v47_v32 }
  0x47   :  { %249 = vmatmul.msk.f32.vlgmr.msra.gmra.mxu1 %vm64_vm0, %v30_v33 }
  0xc3   :  { %v133_v34 = vpop.f32.mrf.mxu0 }
  0xc4   :  { %v204_v35 = vpop.f32.mrf.mxu1 }
  0xc5   :  { %v205_v36 = vadd.f32 %v204_v35, %v133_v34 }
  0xc7   :  { %vm207_vm1 = vcmp.ge.f32.partialorder %v205_v36, 0.0  ;;  %v208_v37 = vmul.f32 0.2, %v205_v36 }
  0xc9   :  { %v209_v38 = vsel %vm207_vm1, %v205_v36, %v208_v37 }
  0xca   :  { %210 = vst [vmem:[%s399_s3] sm:$0x1] %v209_v38 }
  0xcb   :  { %215 = vsyncpa [#allocation3], 1 }

</bundles_post_ra>
